<compile_context>
chip_gen: v5e
topology: v5e:2x2
jax: 0.10.0
libtpu: 0.0.40
codegen_flags: <defaults>
</compile_context>

<pallas_src>
import functools
import numpy as np

import jax
import jax.numpy as jnp
from jax.experimental import pallas as pl
from jax.experimental.pallas import tpu as pltpu


# ----------------------------------------------------------------------------
# Fused MLP kernel: one (TILE_R, C) row tile per grid step
# ----------------------------------------------------------------------------
def mlp_kernel(x_ref, w1_ref, b1_ref, w2_ref, b2_ref, o_ref):
    x = x_ref[...].astype(jnp.float32)                               # (TILE_R, C_in)
    # fc1: hidden dim (4C, typically 128-wide) stays last -> lane-dense tiles.
    h = jnp.dot(x, w1_ref[...], preferred_element_type=jnp.float32) + b1_ref[...]
    # exact (erf) GELU, matching torch.nn.functional.gelu default
    h = 0.5 * h * (1.0 + jax.lax.erf(h * np.float32(1.0 / np.sqrt(2.0))))
    # fc2
    out = jnp.dot(h, w2_ref[...], preferred_element_type=jnp.float32) + b2_ref[...]
    o_ref[...] = out.astype(o_ref.dtype)


def mlp_pallas(x2d, w1_t, b1, w2_t, b2, *, tile_r=512,
               vmem_limit_bytes=64 << 20):
    """x2d: (R, C_in); w1_t: (C_in, H); b1: (1, H); w2_t: (H, C_out); b2: (1, C_out)."""
    R, C_in = x2d.shape
    hidden = w1_t.shape[1]
    C_out = w2_t.shape[1]

    # Row tile: multiple of 8 (sublane), as large as the row count / VMEM allow.
    # (tile_r=512 keeps the fp32 (TILE_R, 4C) GELU intermediate well under the
    #  v7x 64 MiB VMEM budget while still reaching ~85% of HBM roofline.)
    tile_r = max(8, min(tile_r, pl.next_power_of_2(R)))
    r_pad = pl.cdiv(R, tile_r) * tile_r
    if r_pad != R:
        x2d = jnp.pad(x2d, ((0, r_pad - R), (0, 0)))

    grid = (r_pad // tile_r,)

    out = pl.pallas_call(
        mlp_kernel,
        out_shape=jax.ShapeDtypeStruct((r_pad, C_out), x2d.dtype),
        grid=grid,
        in_specs=[
            pl.BlockSpec((tile_r, C_in), lambda i: (i, 0)),   # x row tile
            pl.BlockSpec((C_in, hidden), lambda i: (0, 0)),   # W1^T  (resident)
            pl.BlockSpec((1, hidden), lambda i: (0, 0)),      # b1    (resident)
            pl.BlockSpec((hidden, C_out), lambda i: (0, 0)),  # W2^T  (resident)
            pl.BlockSpec((1, C_out), lambda i: (0, 0)),       # b2    (resident)
        ],
        out_specs=pl.BlockSpec((tile_r, C_out), lambda i: (i, 0)),
        compiler_params=pltpu.CompilerParams(
            dimension_semantics=("parallel",),
            vmem_limit_bytes=vmem_limit_bytes),
    )(x2d, w1_t, b1, w2_t, b2)

    if r_pad != R:
        out = out[:R]
    return out


def mlp_forward(x, params, *, tile_r=512):
    """x: (B, L, C_in) -> (B, L, C_out).  Dropout(p=0)/eval is identity."""
    B, L, C_in = x.shape
    out = mlp_pallas(x.reshape(B * L, C_in), params['w1_t'], params['b1'],
                     params['w2_t'], params['b2'], tile_r=tile_r)
    return out.reshape(B, L, -1)


# ----------------------------------------------------------------------------
# Main
# ----------------------------------------------------------------------------
if __name__ == "__main__":
    # Small shapes consistent with how Mlp is used inside a Swin block:
    # tokens (B, L, C) with C=32, hidden = 4*C = 128.
    B, L, C = 2, 64, 32
    hidden = 4 * C

    key = jax.random.PRNGKey(0)
    k_x, k_w1, k_b1, k_w2, k_b2 = jax.random.split(key, 5)

    def nrm(k, shape, s=0.02):
        return (s * jax.random.normal(k, shape)).astype(jnp.float32)

    # nn.Linear weights stored transposed: (in_features, out_features)
    params = {
        'w1_t': nrm(k_w1, (C, hidden)),
        'b1':   nrm(k_b1, (1, hidden)),
        'w2_t': nrm(k_w2, (hidden, C)),
        'b2':   nrm(k_b2, (1, C)),
    }

    x = jax.random.normal(k_x, (B, L, C), jnp.float32)

    fwd = jax.jit(functools.partial(mlp_forward, tile_r=512))
    out = fwd(x, params)
    jax.block_until_ready(out)

    # Pure-JAX reference (exact erf GELU, matching torch F.gelu default).
    x2 = x.reshape(B * L, C)
    ref = x2 @ params['w1_t'] + params['b1']
    ref = jax.nn.gelu(ref, approximate=False)
    ref = ref @ params['w2_t'] + params['b2']
    ref = ref.reshape(B, L, C)

    assert out.shape == (B, L, C)
    assert bool(jnp.all(jnp.isfinite(out)))
    assert bool(jnp.allclose(out, ref, rtol=1e-5, atol=1e-5))
    print("KERNEL_OK")
</pallas_src>

<mosaic_0001>
module attributes {stable_mosaic.version = 11 : i64} {
  func.func @mlp_kernel(%arg0: i32, %arg1: memref<128x32xf32, #tpu.memory_space<vmem>>, %arg2: memref<32x128xf32, #tpu.memory_space<vmem>>, %arg3: memref<1x128xf32, #tpu.memory_space<vmem>>, %arg4: memref<128x32xf32, #tpu.memory_space<vmem>>, %arg5: memref<1x32xf32, #tpu.memory_space<vmem>>, %arg6: memref<128x32xf32, #tpu.memory_space<vmem>>) attributes {dimension_semantics = [#tpu.dimension_semantics<parallel>], iteration_bounds = array<i64: 1>, scalar_prefetch = 0 : i64, scratch_operands = 0 : i64, tpu.core_type = #tpu.core_type<tc>, window_params = [{transform_indices = @transform_0, window_bounds = array<i64: 128, 32>}, {pipeline_mode = #tpu.pipeline_mode<synchronous>, transform_indices = @transform_1, window_bounds = array<i64: 32, 128>}, {pipeline_mode = #tpu.pipeline_mode<synchronous>, transform_indices = @transform_2, window_bounds = array<i64: 1, 128>}, {pipeline_mode = #tpu.pipeline_mode<synchronous>, transform_indices = @transform_3, window_bounds = array<i64: 128, 32>}, {pipeline_mode = #tpu.pipeline_mode<synchronous>, transform_indices = @transform_4, window_bounds = array<i64: 1, 32>}, {transform_indices = @transform_5, window_bounds = array<i64: 128, 32>}]} {
    %c0 = arith.constant 0 : index
    %c0_0 = arith.constant 0 : index
    %0 = vector.load %arg1[%c0, %c0_0] : memref<128x32xf32, #tpu.memory_space<vmem>>, vector<128x32xf32>
    %c0_1 = arith.constant 0 : index
    %c0_2 = arith.constant 0 : index
    %1 = vector.load %arg2[%c0_1, %c0_2] : memref<32x128xf32, #tpu.memory_space<vmem>>, vector<32x128xf32>
    %cst = arith.constant dense<0.000000e+00> : vector<128x128xf32>
    %2 = tpu.matmul %0, %1, %cst {dimension_numbers = #tpu.dot_dimension_numbers<[1], [0], [0], [1], [0, 0, 1, 1], [], []>} : vector<128x32xf32>, vector<32x128xf32>, vector<128x128xf32> -> vector<128x128xf32>
    %c0_3 = arith.constant 0 : index
    %c0_4 = arith.constant 0 : index
    %3 = vector.load %arg3[%c0_3, %c0_4] : memref<1x128xf32, #tpu.memory_space<vmem>>, vector<1x128xf32>
    %4 = vector.broadcast %3 : vector<1x128xf32> to vector<128x128xf32>
    %5 = arith.addf %2, %4 : vector<128x128xf32>
    %cst_5 = arith.constant 5.000000e-01 : f32
    %6 = vector.broadcast %cst_5 : f32 to vector<128x128xf32>
    %7 = arith.mulf %6, %5 : vector<128x128xf32>
    %cst_6 = arith.constant 0.707106769 : f32
    %8 = vector.broadcast %cst_6 : f32 to vector<128x128xf32>
    %9 = arith.mulf %5, %8 : vector<128x128xf32>
    %10 = math.erf %9 : vector<128x128xf32>
    %cst_7 = arith.constant 1.000000e+00 : f32
    %11 = vector.broadcast %cst_7 : f32 to vector<128x128xf32>
    %12 = arith.addf %11, %10 : vector<128x128xf32>
    %13 = arith.mulf %7, %12 : vector<128x128xf32>
    %c0_8 = arith.constant 0 : index
    %c0_9 = arith.constant 0 : index
    %14 = vector.load %arg4[%c0_8, %c0_9] : memref<128x32xf32, #tpu.memory_space<vmem>>, vector<128x32xf32>
    %cst_10 = arith.constant dense<0.000000e+00> : vector<128x32xf32>
    %15 = tpu.matmul %13, %14, %cst_10 {dimension_numbers = #tpu.dot_dimension_numbers<[1], [0], [0], [1], [0, 0, 1, 1], [], []>} : vector<128x128xf32>, vector<128x32xf32>, vector<128x32xf32> -> vector<128x32xf32>
    %c0_11 = arith.constant 0 : index
    %c0_12 = arith.constant 0 : index
    %16 = vector.load %arg5[%c0_11, %c0_12] : memref<1x32xf32, #tpu.memory_space<vmem>>, vector<1x32xf32>
    %17 = vector.broadcast %16 : vector<1x32xf32> to vector<128x32xf32>
    %18 = arith.addf %15, %17 : vector<128x32xf32>
    %c0_13 = arith.constant 0 : index
    %c0_14 = arith.constant 0 : index
    %19 = vector.load %arg6[%c0_13, %c0_14] : memref<128x32xf32, #tpu.memory_space<vmem>>, vector<128x32xf32>
    tpu.vector_store %arg6[%c0_13, %c0_14], %18 {strides = array<i32>} : memref<128x32xf32, #tpu.memory_space<vmem>>, vector<128x32xf32>,
    return
  }
  func.func @transform_0(%arg0: i32) -> (i32, i32) {
    %c0_i32 = arith.constant 0 : i32
    %c0_i32_0 = arith.constant 0 : i32
    return %arg0, %c0_i32 : i32, i32
  }
  func.func @transform_1(%arg0: i32) -> (i32, i32) {
    %c0_i32 = arith.constant 0 : i32
    %c0_i32_0 = arith.constant 0 : i32
    %c0_i32_1 = arith.constant 0 : i32
    return %c0_i32, %c0_i32_0 : i32, i32
  }
  func.func @transform_2(%arg0: i32) -> (i32, i32) {
    %c0_i32 = arith.constant 0 : i32
    %c0_i32_0 = arith.constant 0 : i32
    %c0_i32_1 = arith.constant 0 : i32
    return %c0_i32, %c0_i32_0 : i32, i32
  }
  func.func @transform_3(%arg0: i32) -> (i32, i32) {
    %c0_i32 = arith.constant 0 : i32
    %c0_i32_0 = arith.constant 0 : i32
    %c0_i32_1 = arith.constant 0 : i32
    return %c0_i32, %c0_i32_0 : i32, i32
  }
  func.func @transform_4(%arg0: i32) -> (i32, i32) {
    %c0_i32 = arith.constant 0 : i32
    %c0_i32_0 = arith.constant 0 : i32
    %c0_i32_1 = arith.constant 0 : i32
    return %c0_i32, %c0_i32_0 : i32, i32
  }
  func.func @transform_5(%arg0: i32) -> (i32, i32) {
    %c0_i32 = arith.constant 0 : i32
    %c0_i32_0 = arith.constant 0 : i32
    return %arg0, %c0_i32 : i32, i32
  }
}

</mosaic_0001>

<bundles_post_ra>
// kernel: mlp_forward.1
= control target key start
LH: loop header
LB: loop body
LE: loop exit
PB: predicated region body
PF: predicated region fallthrough
CT: control target
= control target key end

     0   :  { %vm44_vm0 = vcmask 261120   ;;  %s1938_s1 = inlined_call_operand.vmem [shape: f32[32,128], index: 1, kind: input, shape index: {}]   ;;  %s1939_s0 = inlined_call_operand.vmem [shape: f32[128,32], index: 0, kind: input, shape index: {}]   ;;  %s1940_s2 = inlined_call_operand.vmem [shape: f32[1,128], index: 2, kind: input, shape index: {}]   ;;  %s1941_s3 = inlined_call_operand.vmem [shape: f32[128,32], index: 3, kind: input, shape index: {}]   ;;  %s1942_s4 = inlined_call_operand.vmem [shape: f32[1,32], index: 4, kind: input, shape index: {}]   ;;  %s1943_s5 = inlined_call_operand.vmem [shape: f32[128,32], index: 5, kind: output, shape index: {}]  }
   0x1   :  { %v39_v0 = vld [vmem:[%s1938_s1 + $0x18] sm:$0xff]  ;;  %v38_v1 = vld [vmem:[%s1938_s1 + $0x10] sm:$0xff]  ;;  %v37_v2 = vld [vmem:[%s1938_s1 + $0x8] sm:$0xff] }
   0x2   :  { %105 = vmatpush.msra.mxu0 %v39_v0  ;;  %999 = vmatpush.msra.mxu3 %v39_v0  ;;  %v36_v3 = vld [vmem:[%s1938_s1] sm:$0xff]  ;;  %v30_v5 = vld [vmem:[%s1939_s0 + $0x50] sm:$0xff]  ;;  %v21_v6 = vld [vmem:[%s1939_s0 + $0x8] sm:$0xff] }
   0x3   :  { %v20_v4 = vld [vmem:[%s1939_s0] sm:$0xff]  ;;  %v31_v7 = vld [vmem:[%s1939_s0 + $0x58] sm:$0xff]  ;;  %v22_v8 = vld [vmem:[%s1939_s0 + $0x10] sm:$0xff] }
   0x4   :  { %106 = vmatpush.msra.mxu0 %v38_v1  ;;  %1000 = vmatpush.msra.mxu3 %v38_v1  ;;  %v32_v9 = vld [vmem:[%s1939_s0 + $0x60] sm:$0xff]  ;;  %v23_v10 = vld [vmem:[%s1939_s0 + $0x18] sm:$0xff]  ;;  %v33_v11 = vld [vmem:[%s1939_s0 + $0x68] sm:$0xff] }
   0x5   :  { %v24_v12 = vld [vmem:[%s1939_s0 + $0x20] sm:$0xff]  ;;  %v34_v13 = vld [vmem:[%s1939_s0 + $0x70] sm:$0xff]  ;;  %v25_v14 = vld [vmem:[%s1939_s0 + $0x28] sm:$0xff] }
   0x6   :  { %107 = vmatpush.msra.mxu0 %v37_v2  ;;  %1001 = vmatpush.msra.mxu3 %v37_v2  ;;  %v35_v15 = vld [vmem:[%s1939_s0 + $0x78] sm:$0xff]  ;;  %v26_v16 = vld [vmem:[%s1939_s0 + $0x30] sm:$0xff]  ;;  %v28_v18 = vld [vmem:[%s1939_s0 + $0x40] sm:$0xff] }
   0x7   :  { %v27_v17 = vld [vmem:[%s1939_s0 + $0x38] sm:$0xff]  ;;  %v29_v19 = vld [vmem:[%s1939_s0 + $0x48] sm:$0xff]  ;;  %v876_v21 = vld [vmem:[%s1941_s3 + $0x70] sm:$0xff] }
   0x8   :  { %108 = vmatpush.msra.mxu0 %v36_v3  ;;  %1002 = vmatpush.msra.mxu3 %v36_v3  ;;  %v877_v20 = vld [vmem:[%s1941_s3 + $0x78] sm:$0xff]  ;;  %v875_v22 = vld [vmem:[%s1941_s3 + $0x68] sm:$0xff]  ;;  %v1187_v23 = vld [vmem:[%s1940_s2] ss:$0 sm:$0xff] }
   0x9   :  { %967 = vmatmul.msk.f32.vlgmr.msra.gmra.mxu0 %vm44_vm0, %v20_v4  ;;  %977 = vmatmul.msk.f32.vlgmr.msra.gmra.mxu3 %vm44_vm0, %v30_v5  ;;  %v874_v24 = vld [vmem:[%s1941_s3 + $0x60] sm:$0xff]  ;;  %v873_v25 = vld [vmem:[%s1941_s3 + $0x58] sm:$0xff]  ;;  %v872_v28 = vld [vmem:[%s1941_s3 + $0x50] sm:$0xff] }
   0xa   :  { %882 = vmatpush.msra.mxu1 %v877_v20  ;;  %1004 = vmatpush.msrb.mxu3 %v877_v20  ;;  %v871_v30 = vld [vmem:[%s1941_s3 + $0x48] sm:$0xff]  ;;  %v870_v32 = vld [vmem:[%s1941_s3 + $0x40] sm:$0xff]  ;;  %v869_v36 = vld [vmem:[%s1941_s3 + $0x38] sm:$0xff] }
   0xb   :  { %1003 = vmatpush.msra.mxu2 %v877_v20  ;;  %v868_v41 = vld [vmem:[%s1941_s3 + $0x30] sm:$0xff]  ;;  %v867_v46 = vld [vmem:[%s1941_s3 + $0x28] sm:$0xff]  ;;  %v866_v51 = vld [vmem:[%s1941_s3 + $0x20] sm:$0xff] }
   0xc   :  { %883 = vmatpush.msra.mxu1 %v876_v21  ;;  %1006 = vmatpush.msrb.mxu3 %v876_v21  ;;  %v865_v57 = vld [vmem:[%s1941_s3 + $0x18] sm:$0xff]  ;;  %v864_v0 = vld [vmem:[%s1941_s3 + $0x10] sm:$0xff]  ;;  %v863_v5 = vld [vmem:[%s1941_s3 + $0x8] sm:$0xff] }
   0xd   :  { %1005 = vmatpush.msra.mxu2 %v876_v21 }
   0xe   :  { %884 = vmatpush.msra.mxu1 %v875_v22  ;;  %1008 = vmatpush.msrb.mxu3 %v875_v22 }
   0xf   :  { %1007 = vmatpush.msra.mxu2 %v875_v22 }
  0x10   :  { %885 = vmatpush.msra.mxu1 %v874_v24  ;;  %1010 = vmatpush.msrb.mxu3 %v874_v24 }
  0x11   :  { %968 = vmatmul.msk.f32.gmra.mxu0 %vm44_vm0, %v21_v6  ;;  %978 = vmatmul.msk.f32.gmra.mxu3 %vm44_vm0, %v31_v7 }
  0x12   :  { %1009 = vmatpush.msra.mxu2 %v874_v24  ;;  %886 = vmatpush.msra.mxu1 %v873_v25 }
  0x13   :  { %1012 = vmatpush.msrb.mxu3 %v873_v25 }
  0x14   :  { %1011 = vmatpush.msra.mxu2 %v873_v25  ;;  %887 = vmatpush.msra.mxu1 %v872_v28 }
  0x15   :  { %1014 = vmatpush.msrb.mxu3 %v872_v28 }
  0x16   :  { %1013 = vmatpush.msra.mxu2 %v872_v28  ;;  %888 = vmatpush.msra.mxu1 %v871_v30 }
  0x17   :  { %1016 = vmatpush.msrb.mxu3 %v871_v30 }
  0x18   :  { %1015 = vmatpush.msra.mxu2 %v871_v30  ;;  %889 = vmatpush.msra.mxu1 %v870_v32 }
  0x19   :  { %969 = vmatmul.msk.f32.gmra.mxu0 %vm44_vm0, %v22_v8  ;;  %979 = vmatmul.msk.f32.gmra.mxu3 %vm44_vm0, %v32_v9 }
  0x1a   :  { %1018 = vmatpush.msrb.mxu3 %v870_v32  ;;  %1017 = vmatpush.msra.mxu2 %v870_v32 }
  0x1b   :  { %890 = vmatpush.msra.mxu1 %v869_v36 }
  0x1c   :  { %1020 = vmatpush.msrb.mxu3 %v869_v36  ;;  %1019 = vmatpush.msra.mxu2 %v869_v36 }
  0x1d   :  { %891 = vmatpush.msra.mxu1 %v868_v41 }
  0x1e   :  { %1022 = vmatpush.msrb.mxu3 %v868_v41  ;;  %1021 = vmatpush.msra.mxu2 %v868_v41 }
  0x1f   :  { %892 = vmatpush.msra.mxu1 %v867_v46 }
  0x20   :  { %1024 = vmatpush.msrb.mxu3 %v867_v46  ;;  %1023 = vmatpush.msra.mxu2 %v867_v46 }
  0x21   :  { %970 = vmatmul.msk.f32.gmra.mxu0 %vm44_vm0, %v23_v10  ;;  %980 = vmatmul.msk.f32.gmra.mxu3 %vm44_vm0, %v33_v11  ;;  %v862_v11 = vld [vmem:[%s1941_s3] sm:$0xff] }
  0x22   :  { %893 = vmatpush.msra.mxu1 %v866_v51  ;;  %1026 = vmatpush.msrb.mxu3 %v866_v51 }
  0x23   :  { %1025 = vmatpush.msra.mxu2 %v866_v51 }
  0x24   :  { %894 = vmatpush.msra.mxu1 %v865_v57  ;;  %1028 = vmatpush.msrb.mxu3 %v865_v57 }
  0x25   :  { %1027 = vmatpush.msra.mxu2 %v865_v57 }
  0x26   :  { %895 = vmatpush.msra.mxu1 %v864_v0  ;;  %1030 = vmatpush.msrb.mxu3 %v864_v0 }
  0x27   :  { %1029 = vmatpush.msra.mxu2 %v864_v0 }
  0x28   :  { %896 = vmatpush.msra.mxu1 %v863_v5  ;;  %1032 = vmatpush.msrb.mxu3 %v863_v5 }
  0x29   :  { %971 = vmatmul.msk.f32.gmra.mxu0 %vm44_vm0, %v24_v12  ;;  %981 = vmatmul.msk.f32.gmra.mxu3 %vm44_vm0, %v34_v13 }
  0x2a   :  { %1031 = vmatpush.msra.mxu2 %v863_v5  ;;  %897 = vmatpush.msra.mxu1 %v862_v11 }
  0x2b   :  { %1034 = vmatpush.msrb.mxu3 %v862_v11 }
  0x2c   :  { %1033 = vmatpush.msra.mxu2 %v862_v11 }
  0x31   :  { %972 = vmatmul.msk.f32.gmra.mxu0 %vm44_vm0, %v25_v14  ;;  %982 = vmatmul.msk.f32.gmra.mxu3 %vm44_vm0, %v35_v15 }
  0x39   :  { %973 = vmatmul.msk.f32.gmra.mxu0 %vm44_vm0, %v26_v16 }
  0x41   :  { %974 = vmatmul.msk.f32.gmra.mxu0 %vm44_vm0, %v27_v17 }
  0x49   :  { %975 = vmatmul.msk.f32.gmra.mxu0 %vm44_vm0, %v28_v18 }
  0x51   :  { %976 = vmatmul.msk.f32.gmra.mxu0 %vm44_vm0, %v29_v19 }
  0x86   :  { %v110_v26 = vpop.f32.mrf.mxu0 }
  0x87   :  { %v1196_v27 = vadd.f32 %v1187_v23, %v110_v26 }
  0x89   :  { %v1202_v29 = vmul.f32 0.70710677, %v1196_v27 }
  0x8b   :  { %v190_v31 = vmul.f32 %v1202_v29, %v1202_v29 }
  0x8c   :  { %v140_v33 = vpop.f32.mrf.mxu3 }
  0x8d   :  { %v1212_v34 = vmin.f32 %v190_v31, 16.0  ;;  %v1215_v35 = vadd.f32 %v1187_v23, %v140_v33 }
  0x8e   :  { %v113_v37 = vpop.f32.mrf.mxu0 }
  0x8f   :  { %1950 = vst [vmem:[#allocation2_spill] sm:$0xff] %v1215_v35  ;;  %v192_v38 = vmul.f32 2.1237322e-06, %v1212_v34  ;;  %v1222_v39 = vadd.f32 %v1187_v23, %v113_v37  ;;  %v1225_v40 = vmul.f32 0.70710677, %v1215_v35 }
  0x90   :  { %v203_v42 = vmul.f32 3.8918573e-05, %v1212_v34 }
  0x91   :  { %v193_v43 = vadd.f32 0.00028619796, %v192_v38  ;;  %v1232_v44 = vmul.f32 0.70710677, %v1222_v39  ;;  %v590_v45 = vmul.f32 %v1225_v40, %v1225_v40  ;;  %v1340_v11 = vmul.f32 0.5, %v1222_v39 }
  0x92   :  { %v204_v47 = vadd.f32 0.001143296, %v203_v42 }
  0x93   :  { %v194_v48 = vmul.f32 %v193_v43, %v1212_v34  ;;  %v230_v49 = vmul.f32 %v1232_v44, %v1232_v44  ;;  %v1242_v50 = vmin.f32 %v590_v45, 16.0 }
  0x94   :  { %v143_v52 = vpop.f32.mrf.mxu3  ;;  %v205_v53 = vmul.f32 %v204_v47, %v1212_v34 }
  0x95   :  { %v1248_v54 = vmin.f32 %v230_v49, 16.0  ;;  %v592_v55 = vmul.f32 2.1237322e-06, %v1242_v50  ;;  %v1252_v56 = vadd.f32 %v1187_v23, %v143_v52  ;;  %v195_v58 = vadd.f32 0.0036580483, %v194_v48 }
  0x96   :  { %v116_v59 = vpop.f32.mrf.mxu0  ;;  %v206_v60 = vadd.f32 0.014752088, %v205_v53 }
  0x97   :  { %1951 = vst [vmem:[#allocation3_spill] sm:$0xff] %v1252_v56  ;;  %v232_v61 = vmul.f32 2.1237322e-06, %v1248_v54  ;;  %v1259_v62 = vadd.f32 %v1187_v23, %v116_v59  ;;  %v593_v63 = vadd.f32 0.00028619796, %v592_v55  ;;  %v196_v8 = vmul.f32 %v195_v58, %v1212_v34 }
  0x98   :  { %v1265_v1 = vmul.f32 0.70710677, %v1252_v56  ;;  %v207_v2 = vmul.f32 %v206_v60, %v1212_v34 }
  0x99   :  { %v233_v3 = vadd.f32 0.00028619796, %v232_v61  ;;  %v594_v4 = vmul.f32 %v593_v63, %v1242_v50  ;;  %v1273_v6 = vmul.f32 0.70710677, %v1259_v62  ;;  %v197_v22 = vadd.f32 0.05243302, %v196_v8 }
  0x9a   :  { %v630_v7 = vmul.f32 %v1265_v1, %v1265_v1  ;;  %v208_v12 = vadd.f32 0.112945676, %v207_v2 }
  0x9b   :  { %v234_v9 = vmul.f32 %v233_v3, %v1248_v54  ;;  %v595_v10 = vadd.f32 0.0036580483, %v594_v4  ;;  %v270_v13 = vmul.f32 %v1273_v6, %v1273_v6  ;;  %v198_v42 = vmul.f32 %v197_v22, %v1212_v34 }
  0x9c   :  { %v1284_v14 = vmin.f32 %v630_v7, 16.0  ;;  %v146_v15 = vpop.f32.mrf.mxu3  ;;  %v209_v25 = vmul.f32 %v208_v12, %v1212_v34  ;;  %v1332_v7 = vmul.f32 0.5, %v1196_v27 }
  0x9d   :  { %v235_v16 = vadd.f32 0.0036580483, %v234_v9  ;;  %v596_v17 = vmul.f32 %v595_v10, %v1242_v50  ;;  %v1288_v18 = vadd.f32 %v1187_v23, %v146_v15  ;;  %v1290_v19 = vmin.f32 %v270_v13, 16.0 }
  0x9e   :  { %v119_v20 = vpop.f32.mrf.mxu0  ;;  %v632_v21 = vmul.f32 2.1237322e-06, %v1284_v14  ;;  %v210_v41 = vadd.f32 0.4994258, %v209_v25  ;;  %v199_v58 = vadd.f32 0.18741608, %v198_v42 }
  0x9f   :  { %1952 = vst [vmem:[#allocation4_spill] sm:$0xff] %v1288_v18  ;;  %v1294_v24 = vadd.f32 %v1187_v23, %v119_v20  ;;  %v272_v26 = vmul.f32 2.1237322e-06, %v1290_v19  ;;  %v1299_v30 = vmul.f32 0.70710677, %v1288_v18  ;;  %v236_v31 = vmul.f32 %v235_v16, %v1248_v54 }
  0xa0   :  { %v633_v28 = vadd.f32 0.00028619796, %v632_v21  ;;  %v597_v32 = vadd.f32 0.05243302, %v596_v17  ;;  %v211_v57 = vmul.f32 %v210_v41, %v1212_v34  ;;  %v200_v10 = vmul.f32 %v199_v58, %v1212_v34 }
  0xa1   :  { %1953 = vst [vmem:[#allocation5_spill] sm:$0xff] %v1299_v30  ;;  %v273_v33 = vadd.f32 0.00028619796, %v272_v26  ;;  %v1303_v36 = vmul.f32 0.70710677, %v1294_v24  ;;  %v670_v38 = vmul.f32 %v1299_v30, %v1299_v30 }
  0xa2   :  { %v634_v37 = vmul.f32 %v633_v28, %v1284_v14  ;;  %v237_v46 = vadd.f32 0.05243302, %v236_v31  ;;  %v598_v48 = vmul.f32 %v597_v32, %v1242_v50  ;;  %v1336_v9 = vadd.f32 1.0, %v211_v57 }
  0xa3   :  { %v310_v43 = vmul.f32 %v1303_v36, %v1303_v36  ;;  %v274_v47 = vmul.f32 %v273_v33, %v1290_v19  ;;  %v1315_v53 = vmin.f32 %v670_v38, 16.0  ;;  %v243_v15 = vmul.f32 3.8918573e-05, %v1248_v54 }
  0xa4   :  { %v149_v45 = vpop.f32.mrf.mxu3  ;;  %v635_v51 = vadd.f32 0.0036580483, %v634_v37  ;;  %v238_v61 = vmul.f32 %v237_v46, %v1248_v54  ;;  %v599_v2 = vadd.f32 0.18741608, %v598_v48  ;;  %1037 = vrcp.f32 %v1336_v9 }
  0xa5   :  { %v1313_v49 = vmin.f32 %v310_v43, 16.0  ;;  %v672_v60 = vmul.f32 2.1237322e-06, %v1315_v53  ;;  %v275_v63 = vadd.f32 0.0036580483, %v274_v47  ;;  %v1329_v5 = vadd.f32 %v1187_v23, %v149_v45 }
  0xa6   :  { %v122_v52 = vpop.f32.mrf.mxu0  ;;  %v636_v4 = vmul.f32 %v635_v51, %v1284_v14  ;;  %v239_v16 = vadd.f32 0.18741608, %v238_v61  ;;  %v600_v21 = vmul.f32 %v599_v2, %v1242_v50  ;;  %v201_v32 = vadd.f32 1.1283791, %v200_v10 }
  0xa7   :  { %v1318_v55 = vadd.f32 %v1187_v23, %v122_v52  ;;  %v312_v59 = vmul.f32 2.1237322e-06, %v1313_v49  ;;  %1954 = vst [vmem:[#allocation6_spill] sm:$0xff] %v1329_v5  ;;  %v673_v12 = vadd.f32 0.00028619796, %v672_v60  ;;  %v276_v17 = vmul.f32 %v275_v63, %v1290_v19 }
  0xa8   :  { %v637_v34 = vadd.f32 0.05243302, %v636_v4  ;;  %v1352_v39 = vmul.f32 0.70710677, %v1329_v5  ;;  %v1363_v33 = vmul.f32 0.5, %v1259_v62  ;;  %v240_v46 = vmul.f32 %v239_v16, %v1248_v54 }
  0xa9   :  { %v1325_v0 = vmul.f32 0.70710677, %v1318_v55  ;;  %v313_v3 = vadd.f32 0.00028619796, %v312_v59  ;;  %v674_v37 = vmul.f32 %v673_v12, %v1315_v53  ;;  %v244_v38 = vadd.f32 0.001143296, %v243_v15 }
  0xaa   :  { %1955 = vst [vmem:[#allocation7_spill] sm:$0xff] %v1352_v39  ;;  %v277_v41 = vadd.f32 0.05243302, %v276_v17  ;;  %v601_v47 = vadd.f32 1.1283791, %v600_v21  ;;  %v638_v48 = vmul.f32 %v637_v34, %v1284_v14  ;;  %v710_v62 = vmul.f32 %v1352_v39, %v1352_v39  ;;  %v1389_v2 = vpop.eup %1037 }
  0xab   :  { %v350_v8 = vmul.f32 %v1325_v0, %v1325_v0  ;;  %v314_v22 = vmul.f32 %v313_v3, %v1313_v49  ;;  %v1381_v59 = vmul.f32 %v201_v32, %v1202_v29  ;;  %v1384_v60 = vmul.f32 0.5, %v1294_v24 }
  0xac   :  { %v152_v13 = vpop.f32.mrf.mxu3  ;;  %v675_v61 = vadd.f32 0.0036580483, %v674_v37  ;;  %v1387_v63 = vmul.f32 %v244_v38, %v1248_v54  ;;  %v278_v3 = vmul.f32 %v277_v41, %v1290_v19  ;;  %v241_v12 = vadd.f32 1.1283791, %v240_v46 }
  0xad   :  { %v1344_v20 = vmin.f32 %v350_v8, 16.0  ;;  %v1347_v27 = vadd.f32 %v1187_v23, %v152_v13  ;;  %v315_v51 = vadd.f32 0.0036580483, %v314_v22  ;;  %v1396_v29 = vmul.f32 %v601_v47, %v1225_v40 }
  0xae   :  { %v125_v25 = vpop.f32.mrf.mxu0  ;;  %v639_v13 = vadd.f32 0.18741608, %v638_v48  ;;  %v1401_v21 = vmin.f32 %v710_v62, 16.0  ;;  %v214_v40 = vmul.f32 %v1389_v2, %v1336_v9  ;;  %v279_v32 = vadd.f32 0.18741608, %v278_v3 }
  0xaf   :  { %v352_v26 = vmul.f32 2.1237322e-06, %v1344_v20  ;;  %v1356_v28 = vadd.f32 %v1187_v23, %v125_v25  ;;  %v1359_v31 = vmul.f32 0.70710677, %v1347_v27  ;;  %1956 = vst [vmem:[#allocation8_spill] sm:$0xff] %v1396_v29  ;;  %v316_v16 = vmul.f32 %v315_v51, %v1313_v49 }
  0xb0   :  { %v1410_v37 = vmul.f32 0.5, %v1318_v55  ;;  %v676_v38 = vmul.f32 %v675_v61, %v1315_v53  ;;  %v640_v62 = vmul.f32 %v639_v13, %v1284_v14  ;;  %v215_v61 = vsub.f32 1.0, %v214_v40 }
  0xb1   :  { %v353_v42 = vadd.f32 0.00028619796, %v352_v26  ;;  %v1367_v43 = vmul.f32 0.70710677, %v1356_v28  ;;  %v750_v45 = vmul.f32 %v1359_v31, %v1359_v31  ;;  %v317_v48 = vadd.f32 0.05243302, %v316_v16 }
  0xb2   :  { %v280_v3 = vmul.f32 %v279_v32, %v1290_v19  ;;  %v216_v16 = vmul.f32 %v1389_v2, %v215_v61  ;;  %v1438_v32 = vmul.f32 0.5, %v1356_v28  ;;  %vm219_vm1 = vweird.f32 %v1389_v2 }
  0xb3   :  { %v354_v52 = vmul.f32 %v353_v42, %v1344_v20  ;;  %v390_v57 = vmul.f32 %v1367_v43, %v1367_v43  ;;  %v1378_v58 = vmin.f32 %v750_v45, 16.0  ;;  %v1414_v42 = vmul.f32 %v241_v12, %v1232_v44 }
  0xb4   :  { %v712_v45 = vmul.f32 2.1237322e-06, %v1401_v21  ;;  %vm218_vm2 = vweird.f32 %v1336_v9  ;;  %v222_v61 = vand.u32 2147483647, %v1336_v9 }
  0xb5   :  { %v355_v4 = vadd.f32 0.0036580483, %v354_v52  ;;  %v1392_v8 = vmin.f32 %v390_v57, 16.0  ;;  %v752_v10 = vmul.f32 2.1237322e-06, %v1378_v58  ;;  %vm1452_vm3 = vmor %vm218_vm2, %vm219_vm1 }
  0xb6   :  { %v128_v24 = vpop.f32.mrf.mxu0  ;;  %v763_v15 = vmul.f32 3.8918573e-05, %v1378_v58  ;;  %vm223_vm4 = vcmp.eq.f32.partialorder %v222_v61, 8.507059e+37 }
  0xb7   :  { %v392_v17 = vmul.f32 2.1237322e-06, %v1392_v8  ;;  %v1404_v22 = vadd.f32 %v1187_v23, %v128_v24  ;;  %v356_v34 = vmul.f32 %v355_v4, %v1344_v20  ;;  %v753_v25 = vadd.f32 0.00028619796, %v752_v10 }
  0xb8   :  { %v764_v26 = vadd.f32 0.001143296, %v763_v15  ;;  %v677_v4 = vadd.f32 0.05243302, %v676_v38  ;;  %v713_v24 = vadd.f32 0.00028619796, %v712_v45 }
  0xb9   :  { %v393_v41 = vadd.f32 0.00028619796, %v392_v17  ;;  %v1418_v46 = vmul.f32 0.70710677, %v1404_v22  ;;  %v754_v47 = vmul.f32 %v753_v25, %v1378_v58  ;;  %v357_v52 = vadd.f32 0.05243302, %v356_v34 }
  0xba   :  { %v765_v55 = vmul.f32 %v764_v26, %v1378_v58  ;;  %v318_v17 = vmul.f32 %v317_v48, %v1313_v49  ;;  %v1432_v34 = vadd.f32 1.1283791, %v640_v62  ;;  %v281_v48 = vadd.f32 1.1283791, %v280_v3 }
  0xbb   :  { %v394_v51 = vmul.f32 %v393_v41, %v1392_v8  ;;  %v430_v57 = vmul.f32 %v1418_v46, %v1418_v46  ;;  %v755_v44 = vadd.f32 0.0036580483, %v754_v47  ;;  %v358_v40 = vmul.f32 %v357_v52, %v1344_v20 }
  0xbc   :  { %v766_v12 = vadd.f32 0.014752088, %v765_v55  ;;  %1957 = vst [vmem:[#allocation9_spill] sm:$0xff] %v1432_v34  ;;  %v1444_v62 = vmul.f32 %v677_v4, %v1315_v53  ;;  %v714_v55 = vmul.f32 %v713_v24, %v1401_v21  ;;  %v224_v24 = vand.u32 2147483648, %v1336_v9 }
  0xbd   :  { %v395_v10 = vadd.f32 0.0036580483, %v394_v51  ;;  %v1427_v15 = vmin.f32 %v430_v57, 16.0  ;;  %v756_v13 = vmul.f32 %v755_v44, %v1378_v58  ;;  %v217_v51 = vadd.f32 %v1389_v2, %v216_v16 }
  0xbe   :  { %v767_v26 = vmul.f32 %v766_v12, %v1378_v58  ;;  %1958 = vst [vmem:[#allocation10_spill] sm:$0xff] %v1444_v62  ;;  %v131_v52 = vpop.f32.mrf.mxu0  ;;  %v319_v44 = vadd.f32 0.18741608, %v318_v17  ;;  %v359_v12 = vadd.f32 0.18741608, %v358_v40 }
  0xbf   :  { %v396_v25 = vmul.f32 %v395_v10, %v1392_v8  ;;  %v432_v38 = vmul.f32 2.1237322e-06, %v1427_v15  ;;  %v757_v41 = vadd.f32 0.05243302, %v756_v13  ;;  %v155_v10 = vpop.f32.mrf.mxu3  ;;  %v715_v40 = vadd.f32 0.0036580483, %v714_v55 }
  0xc0   :  { %v768_v47 = vadd.f32 0.112945676, %v767_v26  ;;  %v132_v26 = vadd.f32 %v1187_v23, %v131_v52 }
  0xc1   :  { %v397_v45 = vadd.f32 0.05243302, %v396_v25  ;;  %v433_v57 = vadd.f32 0.00028619796, %v432_v38  ;;  %v758_v3 = vmul.f32 %v757_v41, %v1378_v58  ;;  %v221_v25 = vsel %vm1452_vm3, %v1389_v2, %v217_v51 }
  0xc2   :  { %v769_v28 = vmul.f32 %v768_v47, %v1378_v58  ;;  %v225_v47 = vor.u32 1.1754944e-38, %v224_v24  ;;  %v1463_v41 = vadd.f32 %v1187_v23, %v155_v10  ;;  %v1467_v9 = vmul.f32 0.70710677, %v132_v26 }
  0xc3   :  { %v434_v13 = vmul.f32 %v433_v57, %v1427_v15  ;;  %v398_v16 = vmul.f32 %v397_v45, %v1392_v8  ;;  %v320_v57 = vmul.f32 %v319_v44, %v1313_v49  ;;  %v360_v45 = vmul.f32 %v359_v12, %v1344_v20 }
  0xc4   :  { %v770_v17 = vadd.f32 0.4994258, %v769_v28  ;;  %v759_v2 = vadd.f32 0.18741608, %v758_v3  ;;  %v226_v51 = vsel %vm223_vm4, %v225_v47, %v221_v25  ;;  %v470_v10 = vmul.f32 %v1467_v9, %v1467_v9 }
  0xc5   :  { %v435_v38 = vadd.f32 0.0036580483, %v434_v13  ;;  %v399_v52 = vadd.f32 0.18741608, %v398_v16  ;;  %v227_v13 = vmul.f32 %v226_v51, %v1381_v59  ;;  %v1477_v44 = vmul.f32 %v281_v48, %v1273_v6 }
  0xc6   :  { %v771_v5 = vmul.f32 %v770_v17, %v1378_v58  ;;  %v1480_v4 = vmul.f32 0.70710677, %v1463_v41  ;;  %v246_v12 = vadd.f32 0.014752088, %v1387_v63  ;;  %v321_v24 = vadd.f32 1.1283791, %v320_v57 }
  0xc7   :  { %v436_v28 = vmul.f32 %v435_v38, %v1427_v15  ;;  %v1484_v3 = vmul.f32 %v715_v40, %v1401_v21  ;;  %v361_v59 = vadd.f32 1.1283791, %v360_v45  ;;  %v1491_v16 = vmul.f32 0.5, %v1404_v22 }
  0xc8   :  { %v1471_v55 = vadd.f32 1.0, %v771_v5  ;;  %v1487_v5 = vmul.f32 0.5, %v1347_v27  ;;  %v983_v6 = vclamps-f32 %v227_v13, 1.0  ;;  %v1493_v48 = vmin.f32 %v470_v10, 16.0 }
  0xc9   :  { %v437_v61 = vadd.f32 0.05243302, %v436_v28  ;;  %v790_v63 = vmul.f32 %v1480_v4, %v1480_v4  ;;  %v247_v25 = vmul.f32 %v246_v12, %v1248_v54  ;;  %v283_v40 = vmul.f32 3.8918573e-05, %v1290_v19 }
  0xca   :  { %1039 = vrcp.f32 %v1471_v55  ;;  %v400_v27 = vmul.f32 %v399_v52, %v1392_v8  ;;  %v760_v38 = vmul.f32 %v759_v2, %v1378_v58  ;;  %v830_v47 = vadd.f32 1.0, %v983_v6 }
  0xcb   :  { %v438_v17 = vmul.f32 %v437_v61, %v1427_v15  ;;  %v472_v22 = vmul.f32 2.1237322e-06, %v1493_v48  ;;  %v1504_v57 = vmul.f32 %v321_v24, %v1303_v36  ;;  %v1506_v45 = vmin.f32 %v790_v63, 16.0 }
  0xcc   :  { %v248_v28 = vadd.f32 0.112945676, %v247_v25  ;;  %v284_v51 = vadd.f32 0.001143296, %v283_v40  ;;  %v846_v13 = vmul.f32 %v830_v47, %v1332_v7  ;;  %v1509_v10 = vmul.f32 0.5, %v132_v26  ;;  %v134_v26 = vpop.f32.mrf.mxu0 }
  0xcd   :  { %v473_v61 = vadd.f32 0.00028619796, %v472_v22  ;;  %v323_v12 = vmul.f32 3.8918573e-05, %v1313_v49  ;;  %v439_v58 = vadd.f32 0.18741608, %v438_v17  ;;  %v135_v22 = vadd.f32 %v1187_v23, %v134_v26 }
  0xce   :  { %v792_v2 = vmul.f32 2.1237322e-06, %v1506_v45  ;;  %v249_v6 = vmul.f32 %v248_v28, %v1248_v54  ;;  %v285_v36 = vmul.f32 %v284_v51, %v1290_v19  ;;  %v401_v24 = vadd.f32 1.1283791, %v400_v27  ;;  %898 = vmatmul.f32.vlgmr.msra.gmra.mxu1 %v846_v13 }
  0xcf   :  { %v761_v63 = vadd.f32 1.1283791, %v760_v38  ;;  %v474_v7 = vmul.f32 %v473_v61, %v1493_v48  ;;  %v1522_v18 = vmul.f32 %v361_v59, %v1325_v0  ;;  %v782_v28 = vand.u32 2147483647, %v1471_v55 }
  0xd0   :  { %v1512_v52 = vpop.eup %1039  ;;  %v793_v40 = vadd.f32 0.00028619796, %v792_v2  ;;  %v250_v47 = vadd.f32 0.4994258, %v249_v6  ;;  %v286_v17 = vadd.f32 0.014752088, %v285_v36  ;;  %v440_v38 = vmul.f32 %v439_v58, %v1427_v15 }
  0xd1   :  { %v774_v25 = vmul.f32 %v1512_v52, %v1471_v55  ;;  %v475_v51 = vadd.f32 0.0036580483, %v474_v7  ;;  %v324_v27 = vadd.f32 0.001143296, %v323_v12  ;;  %v1528_v61 = vmul.f32 0.70710677, %v135_v22 }
  0xd2   :  { %v794_v39 = vmul.f32 %v793_v40, %v1506_v45  ;;  %v251_v13 = vmul.f32 %v250_v47, %v1248_v54  ;;  %v287_v6 = vmul.f32 %v286_v17, %v1290_v19  ;;  %v363_v0 = vmul.f32 3.8918573e-05, %v1344_v20 }
  0xd3   :  { %v476_v2 = vmul.f32 %v475_v51, %v1493_v48  ;;  %v325_v36 = vmul.f32 %v324_v27, %v1313_v49  ;;  %v775_v59 = vsub.f32 1.0, %v774_v25  ;;  %v510_v12 = vmul.f32 %v1528_v61, %v1528_v61 }
  0xd4   :  { %v795_v26 = vadd.f32 0.0036580483, %v794_v39  ;;  %v1534_v7 = vadd.f32 1.0, %v251_v13  ;;  %v784_v58 = vand.u32 2147483648, %v1471_v55  ;;  %v1540_v40 = vmul.f32 0.5, %v1463_v41 }
  0xd5   :  { %v477_v54 = vadd.f32 0.05243302, %v476_v2  ;;  %v288_v47 = vadd.f32 0.112945676, %v287_v6  ;;  %v1543_v17 = vmul.f32 %v761_v63, %v1359_v31  ;;  %v326_v39 = vadd.f32 0.014752088, %v325_v36  ;;  %v137_v36 = vpop.f32.mrf.mxu0 }
  0xd6   :  { %v796_v51 = vmul.f32 %v795_v26, %v1506_v45  ;;  %1041 = vrcp.f32 %v1534_v7  ;;  %v441_v25 = vadd.f32 1.1283791, %v440_v38  ;;  %v1548_v13 = vmin.f32 %v510_v12, 16.0 }
  0xd7   :  { %v478_v27 = vmul.f32 %v477_v54, %v1493_v48  ;;  %v364_v30 = vadd.f32 0.001143296, %v363_v0  ;;  %v1551_v2 = vmul.f32 %v401_v24, %v1367_v43  ;;  %v776_v41 = vmul.f32 %v1512_v52, %v775_v59 }
  0xd8   :  { %vm778_vm5 = vweird.f32 %v1471_v55  ;;  %v289_v31 = vmul.f32 %v288_v47, %v1290_v19  ;;  %vm779_vm6 = vweird.f32 %v1512_v52  ;;  %vm1557_vm7 = vcmp.eq.f32.partialorder %v782_v28, 8.507059e+37 }
  0xd9   :  { %v785_v38 = vor.u32 1.1754944e-38, %v784_v58  ;;  %v512_v6 = vmul.f32 2.1237322e-06, %v1548_v13  ;;  %v797_v0 = vadd.f32 0.05243302, %v796_v51  ;;  %v1563_v43 = vadd.f32 %v1187_v23, %v137_v36  ;;  %vm1581_vm8 = vmor %vm778_vm5, %vm779_vm6 }
  0xda   :  { %v290_v26 = vadd.f32 0.4994258, %v289_v31  ;;  %v327_v24 = vmul.f32 %v326_v39, %v1313_v49  ;;  %v1567_v59 = vmul.f32 %v441_v25, %v1418_v46  ;;  %v479_v12 = vadd.f32 0.18741608, %v478_v27 }
  0xdb   :  { %v513_v54 = vadd.f32 0.00028619796, %v512_v6  ;;  %v365_v28 = vmul.f32 %v364_v30, %v1344_v20  ;;  %v777_v58 = vadd.f32 %v1512_v52, %v776_v41  ;;  %v1571_v56 = vmul.f32 0.5, %v135_v22 }
  0xdc   :  { %v1042_v47 = vpop.eup %1041  ;;  %v291_v51 = vmul.f32 %v290_v26, %v1290_v19  ;;  %v1575_v31 = vmul.f32 0.70710677, %v1563_v43  ;;  %v262_v46 = vand.u32 2147483647, %v1534_v7  ;;  %v264_v22 = vand.u32 2147483648, %v1534_v7 }
  0xdd   :  { %v254_v30 = vmul.f32 %v1042_v47, %v1534_v7  ;;  %v514_v39 = vmul.f32 %v513_v54, %v1548_v13  ;;  %v798_v19 = vmul.f32 %v797_v0, %v1506_v45  ;;  %v328_v55 = vadd.f32 0.112945676, %v327_v24 }
  0xde   :  { %v1590_v25 = vadd.f32 1.0, %v291_v51  ;;  %v550_v27 = vmul.f32 %v1575_v31, %v1575_v31  ;;  %v480_v41 = vmul.f32 %v479_v12, %v1493_v48  ;;  %v366_v26 = vadd.f32 0.014752088, %v365_v28 }
  0xdf   :  { %v255_v6 = vsub.f32 1.0, %v254_v30  ;;  %v515_v36 = vadd.f32 0.0036580483, %v514_v39  ;;  %v781_v35 = vsel %vm1581_vm8, %v1512_v52, %v777_v58  ;;  %vm258_vm9 = vweird.f32 %v1534_v7 }
  0xe0   :  { %1043 = vrcp.f32 %v1590_v25  ;;  %v403_v0 = vmul.f32 3.8918573e-05, %v1392_v8  ;;  %vm259_vm10 = vweird.f32 %v1042_v47  ;;  %v1602_v24 = vmin.f32 %v550_v27, 16.0 }
  0xe1   :  { %v256_v54 = vmul.f32 %v1042_v47, %v255_v6  ;;  %v516_v51 = vmul.f32 %v515_v36, %v1548_v13  ;;  %vm1604_vm11 = vcmp.eq.f32.partialorder %v262_v46, 8.507059e+37  ;;  %v265_v28 = vor.u32 1.1754944e-38, %v264_v22  ;;  %vm260_vm12 = vmor %vm258_vm9, %vm259_vm10 }
  0xe2   :  { %v329_v23 = vmul.f32 %v328_v55, %v1313_v49  ;;  %v367_v52 = vmul.f32 %v366_v26, %v1344_v20  ;;  %v481_v58 = vadd.f32 1.1283791, %v480_v41  ;;  %v799_v30 = vadd.f32 0.18741608, %v798_v19 }
  0xe3   :  { %v257_v39 = vadd.f32 %v1042_v47, %v256_v54  ;;  %v552_v62 = vmul.f32 2.1237322e-06, %v1602_v24  ;;  %v786_v6 = vsel %vm1557_vm7, %v785_v38, %v781_v35  ;;  %v404_v36 = vadd.f32 0.001143296, %v403_v0 }
  0xe4   :  { %v330_v46 = vadd.f32 0.4994258, %v329_v23  ;;  %v368_v27 = vadd.f32 0.112945676, %v367_v52  ;;  %v517_v22 = vadd.f32 0.05243302, %v516_v51  ;;  %v1622_v7 = vmul.f32 %v786_v6, %v1543_v17 }
  0xe5   :  { %v261_v29 = vsel %vm260_vm12, %v1042_v47, %v257_v39  ;;  %v553_v34 = vadd.f32 0.00028619796, %v552_v62  ;;  %v443_v55 = vmul.f32 3.8918573e-05, %v1427_v15  ;;  %v405_v35 = vmul.f32 %v404_v36, %v1392_v8 }
  0xe6   :  { %v1044_v26 = vpop.eup %1043  ;;  %v266_v19 = vsel %vm1604_vm11, %v265_v28, %v261_v29  ;;  %v331_v41 = vmul.f32 %v330_v46, %v1313_v49  ;;  %v369_v63 = vmul.f32 %v368_v27, %v1344_v20  ;;  %v800_v38 = vmul.f32 %v799_v30, %v1506_v45 }
  0xe7   :  { %v267_v47 = vmul.f32 %v266_v19, %v1414_v42  ;;  %v294_v62 = vmul.f32 %v1044_v26, %v1590_v25  ;;  %v554_v0 = vmul.f32 %v553_v34, %v1602_v24  ;;  %v406_v51 = vadd.f32 0.014752088, %v405_v35 }
  0xe8   :  { %v1628_v54 = vadd.f32 1.0, %v331_v41  ;;  %v370_v29 = vadd.f32 0.4994258, %v369_v63  ;;  %v518_v12 = vmul.f32 %v517_v22, %v1548_v13  ;;  %v304_v23 = vand.u32 2147483648, %v1590_v25 }
  0xe9   :  { %v984_v49 = vclamps-f32 %v267_v47, 1.0  ;;  %v295_v28 = vsub.f32 1.0, %v294_v62  ;;  %v1633_v17 = vmul.f32 %v481_v58, %v1467_v9  ;;  %v555_v52 = vadd.f32 0.0036580483, %v554_v0 }
  0xea   :  { %1045 = vrcp.f32 %v1628_v54  ;;  %v444_v42 = vadd.f32 0.001143296, %v443_v55  ;;  %vm299_vm13 = vweird.f32 %v1044_v26  ;;  %v302_v34 = vand.u32 2147483647, %v1590_v25 }
  0xeb   :  { %v831_v30 = vadd.f32 1.0, %v984_v49  ;;  %v296_v39 = vmul.f32 %v1044_v26, %v295_v28  ;;  %v801_v6 = vadd.f32 1.1283791, %v800_v38  ;;  %vm298_vm14 = vweird.f32 %v1590_v25 }
  0xec   :  { %v371_v46 = vmul.f32 %v370_v29, %v1344_v20  ;;  %v407_v27 = vmul.f32 %v406_v51, %v1392_v8  ;;  %v519_v9 = vadd.f32 0.18741608, %v518_v12  ;;  %v305_v22 = vor.u32 1.1754944e-38, %v304_v23  ;;  %vm300_vm15 = vmor %vm298_vm14, %vm299_vm13 }
  0xed   :  { %v847_v36 = vmul.f32 %v831_v30, %v1340_v11  ;;  %v297_v58 = vadd.f32 %v1044_v26, %v296_v39  ;;  %v556_v55 = vmul.f32 %v555_v52, %v1602_v24  ;;  %v445_v63 = vmul.f32 %v444_v42, %v1427_v15 }
  0xee   :  { %v1642_v19 = vadd.f32 1.0, %v371_v46  ;;  %v408_v41 = vadd.f32 0.112945676, %v407_v27  ;;  %vm303_vm1 = vcmp.eq.f32.partialorder %v302_v34, 8.507059e+37  ;;  %v342_v20 = vand.u32 2147483647, %v1628_v54 }
  0xef   :  { %901 = vmatmul.f32.gmra.mxu1 %v847_v36  ;;  %v301_v35 = vsel %vm300_vm15, %v1044_v26, %v297_v58  ;;  %v483_v25 = vmul.f32 3.8918573e-05, %v1493_v48  ;;  %v1648_v11 = vmul.f32 %v801_v6, %v1480_v4  ;;  %v344_v62 = vand.u32 2147483648, %v1628_v54 }
  0xf0   :  { %v1046_v38 = vpop.eup %1045  ;;  %v306_v47 = vsel %vm303_vm1, %v305_v22, %v301_v35  ;;  %1047 = vrcp.f32 %v1642_v19  ;;  %v1653_v0 = vmul.f32 %v519_v9, %v1548_v13  ;;  %v803_v51 = vmul.f32 3.8918573e-05, %v1506_v45 }
  0xf1   :  { %v307_v29 = vmul.f32 %v306_v47, %v1477_v44  ;;  %v334_v26 = vmul.f32 %v1046_v38, %v1628_v54  ;;  %v557_v49 = vadd.f32 0.05243302, %v556_v55  ;;  %vm338_vm2 = vweird.f32 %v1628_v54 }
  0xf2   :  { %v409_v4 = vmul.f32 %v408_v41, %v1392_v8  ;;  %v446_v12 = vadd.f32 0.014752088, %v445_v63  ;;  %vm1660_vm3 = vcmp.eq.f32.partialorder %v342_v20, 8.507059e+37  ;;  %v484_v42 = vadd.f32 0.001143296, %v483_v25 }
  0xf3   :  { %v985_v28 = vclamps-f32 %v307_v29, 1.0  ;;  %v335_v23 = vsub.f32 1.0, %v334_v26  ;;  %vm339_vm4 = vweird.f32 %v1046_v38  ;;  %v345_v30 = vor.u32 1.1754944e-38, %v344_v62 }
  0xf4   :  { %v410_v44 = vadd.f32 0.4994258, %v409_v4  ;;  %v447_v39 = vmul.f32 %v446_v12, %v1427_v15  ;;  %v485_v46 = vmul.f32 %v484_v42, %v1493_v48  ;;  %v804_v27 = vadd.f32 0.001143296, %v803_v51  ;;  %vm340_vm5 = vmor %vm338_vm2, %vm339_vm4 }
  0xf5   :  { %v832_v34 = vadd.f32 1.0, %v985_v28  ;;  %v336_v6 = vmul.f32 %v1046_v38, %v335_v23  ;;  %v558_v9 = vmul.f32 %v557_v49, %v1602_v24  ;;  %v523_v55 = vmul.f32 3.8918573e-05, %v1548_v13 }
  0xf6   :  { %v1048_v36 = vpop.eup %1047  ;;  %v411_v58 = vmul.f32 %v410_v44, %v1392_v8  ;;  %v448_v22 = vadd.f32 0.112945676, %v447_v39  ;;  %v382_v20 = vand.u32 2147483647, %v1642_v19  ;;  %v384_v25 = vand.u32 2147483648, %v1642_v19 }
  0xf7   :  { %v848_v41 = vmul.f32 %v832_v34, %v1363_v33  ;;  %v337_v63 = vadd.f32 %v1046_v38, %v336_v6  ;;  %v374_v35 = vmul.f32 %v1048_v36, %v1642_v19  ;;  %v997_v62 = vclamps-f32 %v1622_v7, 1.0 }
  0xf8   :  { %v1676_v47 = vadd.f32 1.0, %v411_v58  ;;  %v449_v8 = vmul.f32 %v448_v22, %v1427_v15  ;;  %v486_v26 = vadd.f32 0.014752088, %v485_v46  ;;  %v805_v51 = vmul.f32 %v804_v27, %v1506_v45 }
  0xf9   :  { %904 = vmatmul.f32.gmra.mxu1 %v848_v41  ;;  %v341_v29 = vsel %vm340_vm5, %v1046_v38, %v337_v63  ;;  %v375_v33 = vsub.f32 1.0, %v374_v35  ;;  %vm378_vm6 = vweird.f32 %v1642_v19  ;;  %v524_v54 = vadd.f32 0.001143296, %v523_v55 }
  0xfa   :  { %v346_v49 = vsel %vm1660_vm3, %v345_v30, %v341_v29  ;;  %1049 = vrcp.f32 %v1676_v47  ;;  %vm379_vm7 = vweird.f32 %v1048_v36  ;;  %v450_v28 = vadd.f32 0.4994258, %v449_v8 }
  0xfb   :  { %v347_v4 = vmul.f32 %v346_v49, %v1504_v57  ;;  %v376_v12 = vmul.f32 %v1048_v36, %v375_v33  ;;  %vm1686_vm8 = vcmp.eq.f32.partialorder %v382_v20, 8.507059e+37  ;;  %v844_v38 = vadd.f32 1.0, %v997_v62  ;;  %vm380_vm9 = vmor %vm378_vm6, %vm379_vm7 }
  0xfc   :  { %v487_v23 = vmul.f32 %v486_v26, %v1493_v48  ;;  %v806_v42 = vadd.f32 0.014752088, %v805_v51  ;;  %v385_v44 = vor.u32 1.1754944e-38, %v384_v25  ;;  %v451_v39 = vmul.f32 %v450_v28, %v1427_v15 }
  0xfd   :  { %v986_v52 = vclamps-f32 %v347_v4, 1.0  ;;  %v377_v30 = vadd.f32 %v1048_v36, %v376_v12  ;;  %v860_v57 = vmul.f32 %v844_v38, %v1487_v5  ;;  %v525_v46 = vmul.f32 %v524_v54, %v1548_v13 }
  0xfe   :  { %v488_v34 = vadd.f32 0.112945676, %v487_v23  ;;  %v807_v6 = vmul.f32 %v806_v42, %v1506_v45  ;;  %v1697_v22 = vadd.f32 1.0, %v451_v39  ;;  %v563_v55 = vmul.f32 3.8918573e-05, %v1602_v24 }
  0xff   :  { %v833_v27 = vadd.f32 1.0, %v986_v52  ;;  %v381_v58 = vsel %vm380_vm9, %v1048_v36, %v377_v30  ;;  %940 = vmatmul.f32.vlgmr.msrb.gmra.mxu3 %v860_v57  ;;  %v526_v5 = vadd.f32 0.014752088, %v525_v46  ;;  %v1704_v35 = vadd.f32 1.1283791, %v1653_v0 }
 0x100   :  { %v1050_v41 = vpop.eup %1049  ;;  %v386_v15 = vsel %vm1686_vm8, %v385_v44, %v381_v58  ;;  %v489_v19 = vmul.f32 %v488_v34, %v1493_v48  ;;  %v808_v63 = vadd.f32 0.112945676, %v807_v6  ;;  %v559_v8 = vadd.f32 0.18741608, %v558_v9 }
 0x101   :  { %v849_v20 = vmul.f32 %v833_v27, %v1384_v60  ;;  %v387_v36 = vmul.f32 %v386_v15, %v1522_v18  ;;  %v414_v25 = vmul.f32 %v1050_v41, %v1676_v47  ;;  %vm418_vm10 = vweird.f32 %v1676_v47 }
 0x102   :  { %v422_v62 = vand.u32 2147483647, %v1676_v47  ;;  %1051 = vrcp.f32 %v1697_v22  ;;  %v490_v26 = vadd.f32 0.4994258, %v489_v19  ;;  %v809_v0 = vmul.f32 %v808_v63, %v1506_v45 }
 0x103   :  { %907 = vmatmul.f32.gmra.mxu1 %v849_v20  ;;  %v987_v29 = vclamps-f32 %v387_v36, 1.0  ;;  %v415_v33 = vsub.f32 1.0, %v414_v25  ;;  %vm419_vm11 = vweird.f32 %v1050_v41  ;;  %v424_v60 = vand.u32 2147483648, %v1676_v47 }
 0x104   :  { %v527_v18 = vmul.f32 %v526_v5, %v1548_v13  ;;  %v564_v51 = vadd.f32 0.001143296, %v563_v55  ;;  %v491_v54 = vmul.f32 %v490_v26, %v1493_v48  ;;  %v810_v4 = vadd.f32 0.4994258, %v809_v0  ;;  %vm420_vm12 = vmor %vm418_vm10, %vm419_vm11 }
 0x105   :  { %v834_v49 = vadd.f32 1.0, %v987_v29  ;;  %v416_v9 = vmul.f32 %v1050_v41, %v415_v33  ;;  %v603_v7 = vmul.f32 3.8918573e-05, %v1242_v50  ;;  %v643_v38 = vmul.f32 3.8918573e-05, %v1284_v14 }
 0x106   :  { %v528_v12 = vadd.f32 0.112945676, %v527_v18  ;;  %v565_v28 = vmul.f32 %v564_v51, %v1602_v24  ;;  %v1720_v52 = vadd.f32 1.0, %v491_v54  ;;  %v811_v30 = vmul.f32 %v810_v4, %v1506_v45 }
 0x107   :  { %v850_v23 = vmul.f32 %v834_v49, %v1410_v37  ;;  %v417_v42 = vadd.f32 %v1050_v41, %v416_v9  ;;  %v425_v48 = vor.u32 1.1754944e-38, %v424_v60  ;;  %v604_v34 = vadd.f32 0.001143296, %v603_v7 }
 0x108   :  { %v1052_v44 = vpop.eup %1051  ;;  %v529_v39 = vmul.f32 %v528_v12, %v1548_v13  ;;  %v566_v57 = vadd.f32 0.014752088, %v565_v28  ;;  %vm423_vm13 = vcmp.eq.f32.partialorder %v422_v62, 8.507059e+37  ;;  %1053 = vrcp.f32 %v1720_v52 }
 0x109   :  { %v421_v6 = vsel %vm420_vm12, %v1050_v41, %v417_v42  ;;  %v454_v46 = vmul.f32 %v1052_v44, %v1697_v22  ;;  %v1730_v37 = vmul.f32 %v559_v8, %v1602_v24  ;;  %v462_v27 = vand.u32 2147483647, %v1697_v22 }
 0x10a   :  { %v426_v45 = vsel %vm423_vm13, %v425_v48, %v421_v6  ;;  %v644_v58 = vadd.f32 0.001143296, %v643_v38  ;;  %v1734_v15 = vadd.f32 1.0, %v811_v30  ;;  %v530_v19 = vadd.f32 0.4994258, %v529_v39 }
 0x10b   :  { %910 = vmatmul.f32.gmra.mxu1 %v850_v23  ;;  %v427_v47 = vmul.f32 %v426_v45, %v1551_v2  ;;  %v455_v55 = vsub.f32 1.0, %v454_v46  ;;  %vm458_vm14 = vweird.f32 %v1697_v22  ;;  %v464_v41 = vand.u32 2147483648, %v1697_v22 }
 0x10c   :  { %v567_v63 = vmul.f32 %v566_v57, %v1602_v24  ;;  %v605_v5 = vmul.f32 %v604_v34, %v1242_v50  ;;  %vm459_vm15 = vweird.f32 %v1052_v44  ;;  %1055 = vrcp.f32 %v1734_v15 }
 0x10d   :  { %v988_v20 = vclamps-f32 %v427_v47, 1.0  ;;  %v456_v36 = vmul.f32 %v1052_v44, %v455_v55  ;;  %vm1741_vm1 = vcmp.eq.f32.partialorder %v462_v27, 8.507059e+37  ;;  %v502_v2 = vand.u32 2147483647, %v1720_v52  ;;  %vm460_vm2 = vmor %vm458_vm14, %vm459_vm15 }
 0x10e   :  { %v531_v8 = vmul.f32 %v530_v19, %v1548_v13  ;;  %v568_v62 = vadd.f32 0.112945676, %v567_v63  ;;  %v1054_v29 = vpop.eup %1053  ;;  %v606_v0 = vadd.f32 0.014752088, %v605_v5  ;;  %v645_v60 = vmul.f32 %v644_v58, %v1284_v14 }
 0x10f   :  { %v835_v33 = vadd.f32 1.0, %v988_v20  ;;  %v457_v26 = vadd.f32 %v1052_v44, %v456_v36  ;;  %v465_v18 = vor.u32 1.1754944e-38, %v464_v41  ;;  %v494_v51 = vmul.f32 %v1054_v29, %v1720_v52 }
 0x110   :  { %vm498_vm3 = vweird.f32 %v1720_v52  ;;  %v504_v49 = vand.u32 2147483648, %v1720_v52  ;;  %v1754_v54 = vadd.f32 1.0, %v531_v8  ;;  %v569_v4 = vmul.f32 %v568_v62, %v1602_v24 }
 0x111   :  { %v851_v9 = vmul.f32 %v835_v33, %v1438_v32  ;;  %v461_v13 = vsel %vm460_vm2, %v1052_v44, %v457_v26  ;;  %v495_v28 = vsub.f32 1.0, %v494_v51  ;;  %v607_v22 = vmul.f32 %v606_v0, %v1242_v50 }
 0x112   :  { %v466_v12 = vsel %vm1741_vm1, %v465_v18, %v461_v13  ;;  %v646_v7 = vadd.f32 0.014752088, %v645_v60  ;;  %v1056_v38 = vpop.eup %1055  ;;  %vm1761_vm4 = vcmp.eq.f32.partialorder %v502_v2, 8.507059e+37  ;;  %v822_v32 = vand.u32 2147483647, %v1734_v15 }
 0x113   :  { %913 = vmatmul.f32.gmra.mxu1 %v851_v9  ;;  %v467_v23 = vmul.f32 %v466_v12, %v1567_v59  ;;  %1057 = vrcp.f32 %v1754_v54  ;;  %v496_v30 = vmul.f32 %v1054_v29, %v495_v28  ;;  %vm499_vm5 = vweird.f32 %v1054_v29 }
 0x114   :  { %v814_v44 = vmul.f32 %v1056_v38, %v1734_v15  ;;  %v824_v48 = vand.u32 2147483648, %v1734_v15  ;;  %vm818_vm6 = vweird.f32 %v1734_v15  ;;  %v570_v57 = vadd.f32 0.4994258, %v569_v4  ;;  %vm500_vm8 = vmor %vm498_vm3, %vm499_vm5 }
 0x115   :  { %v989_v39 = vclamps-f32 %v467_v23, 1.0  ;;  %v608_v34 = vadd.f32 0.112945676, %v607_v22  ;;  %v497_v59 = vadd.f32 %v1054_v29, %v496_v30  ;;  %vm819_vm7 = vweird.f32 %v1056_v38 }
 0x116   :  { %v815_v6 = vsub.f32 1.0, %v814_v44  ;;  %v647_v46 = vmul.f32 %v646_v7, %v1284_v14  ;;  %v505_v27 = vor.u32 1.1754944e-38, %v504_v49  ;;  %v571_v58 = vmul.f32 %v570_v57, %v1602_v24  ;;  %vm1780_vm9 = vmor %vm818_vm6, %vm819_vm7 }
 0x117   :  { %v836_v45 = vadd.f32 1.0, %v989_v39  ;;  %v609_v47 = vmul.f32 %v608_v34, %v1242_v50  ;;  %v501_v55 = vsel %vm500_vm8, %v1054_v29, %v497_v59  ;;  %v825_v41 = vor.u32 1.1754944e-38, %v824_v48 }
 0x118   :  { %v816_v19 = vmul.f32 %v1056_v38, %v815_v6  ;;  %v648_v63 = vadd.f32 0.112945676, %v647_v46  ;;  %v506_v36 = vsel %vm1761_vm4, %v505_v27, %v501_v55  ;;  %v1784_v25 = vadd.f32 1.0, %v571_v58 }
 0x119   :  { %v1058_v5 = vpop.eup %1057  ;;  %v852_v20 = vmul.f32 %v836_v45, %v1491_v16  ;;  %v610_v24 = vadd.f32 0.4994258, %v609_v47  ;;  %v507_v2 = vmul.f32 %v506_v36, %v1633_v17  ;;  %vm823_vm10 = vcmp.eq.f32.partialorder %v822_v32, 8.507059e+37 }
 0x11a   :  { %v817_v8 = vadd.f32 %v1056_v38, %v816_v19  ;;  %v534_v62 = vmul.f32 %v1058_v5, %v1754_v54  ;;  %v542_v16 = vand.u32 2147483647, %v1754_v54  ;;  %v544_v29 = vand.u32 2147483648, %v1754_v54 }
 0x11b   :  { %916 = vmatmul.f32.gmra.mxu1 %v852_v20  ;;  %1059 = vrcp.f32 %v1784_v25  ;;  %v683_v15 = vmul.f32 3.8918573e-05, %v1315_v53  ;;  %v990_v33 = vclamps-f32 %v507_v2, 1.0  ;;  %v611_v17 = vmul.f32 %v610_v24, %v1242_v50 }
 0x11c   :  { %v821_v26 = vsel %vm1780_vm9, %v1056_v38, %v817_v8  ;;  %v535_v0 = vsub.f32 1.0, %v534_v62  ;;  %vm539_vm11 = vweird.f32 %v1058_v5  ;;  %v649_v18 = vmul.f32 %v648_v63, %v1284_v14 }
 0x11d   :  { %v826_v60 = vsel %vm823_vm10, %v825_v41, %v821_v26  ;;  %v723_v51 = vmul.f32 3.8918573e-05, %v1401_v21  ;;  %v837_v49 = vadd.f32 1.0, %v990_v33  ;;  %v612_v4 = vadd.f32 1.0, %v611_v17 }
 0x11e   :  { %v827_v9 = vmul.f32 %v826_v60, %v1648_v11  ;;  %v536_v13 = vmul.f32 %v1058_v5, %v535_v0  ;;  %v561_v12 = vadd.f32 1.1283791, %v1730_v37  ;;  %vm538_vm12 = vweird.f32 %v1754_v54 }
 0x11f   :  { %v650_v28 = vadd.f32 0.4994258, %v649_v18  ;;  %v684_v22 = vadd.f32 0.001143296, %v683_v15  ;;  %v853_v7 = vmul.f32 %v837_v49, %v1509_v10  ;;  %1061 = vrcp.f32 %v612_v4  ;;  %vm540_vm13 = vmor %vm538_vm12, %vm539_vm11 }
 0x120   :  { %v998_v50 = vclamps-f32 %v827_v9, 1.0  ;;  %v537_v38 = vadd.f32 %v1058_v5, %v536_v13  ;;  %v522_v42 = vmul.f32 %v1704_v35, %v1528_v61  ;;  %vm543_vm14 = vcmp.eq.f32.partialorder %v542_v16, 8.507059e+37 }
 0x121   :  { %v1060_v23 = vpop.eup %1059  ;;  %v545_v11 = vor.u32 1.1754944e-38, %v544_v29  ;;  %v651_v32 = vmul.f32 %v650_v28, %v1284_v14  ;;  %919 = vmatmul.f32.vlgmr.msra.gmra.mxu2 %v853_v7  ;;  %v724_v44 = vadd.f32 0.001143296, %v723_v51  ;;  %v562_v10 = vmul.f32 %v561_v12, %v1575_v31 }
 0x122   :  { %v845_v37 = vadd.f32 1.0, %v998_v50  ;;  %v541_v54 = vsel %vm540_vm13, %v1058_v5, %v537_v38  ;;  %v574_v30 = vmul.f32 %v1060_v23, %v1784_v25  ;;  %v582_v39 = vand.u32 2147483647, %v1784_v25 }
 0x123   :  { %v546_v48 = vsel %vm543_vm14, %v545_v11, %v541_v54  ;;  %v1808_v57 = vadd.f32 1.0, %v651_v32  ;;  %v685_v59 = vmul.f32 %v684_v22, %v1315_v53  ;;  %vm578_vm15 = vweird.f32 %v1784_v25  ;;  %v1984_v32 = vld [vmem:[#allocation8_spill] sm:$0xff] }
 0x124   :  { %v861_v61 = vmul.f32 %v845_v37, %v1540_v40  ;;  %v547_v35 = vmul.f32 %v546_v48, %v522_v42  ;;  %v575_v34 = vsub.f32 1.0, %v574_v30  ;;  %vm579_vm1 = vweird.f32 %v1060_v23  ;;  %v1983_v42 = vld [vmem:[#allocation9_spill] sm:$0xff] }
 0x125   :  { %v584_v14 = vand.u32 2147483648, %v1784_v25  ;;  %1063 = vrcp.f32 %v1808_v57  ;;  %v1062_v6 = vpop.eup %1061  ;;  %v686_v45 = vadd.f32 0.014752088, %v685_v59  ;;  %v725_v27 = vmul.f32 %v724_v44, %v1401_v21  ;;  %vm580_vm3 = vmor %vm578_vm15, %vm579_vm1 }
 0x126   :  { %943 = vmatmul.f32.gmra.mxu3 %v861_v61  ;;  %v991_v31 = vclamps-f32 %v547_v35, 1.0  ;;  %v576_v46 = vmul.f32 %v1060_v23, %v575_v34  ;;  %vm1816_vm2 = vcmp.eq.f32.partialorder %v582_v39, 8.507059e+37  ;;  %v614_v58 = vmul.f32 %v1062_v6, %v612_v4  ;;  %v1985_v61 = vld [vmem:[#allocation10_spill] sm:$0xff] }
 0x127   :  { %v622_v47 = vand.u32 2147483647, %v612_v4  ;;  %v624_v55 = vand.u32 2147483648, %v612_v4  ;;  %v687_v63 = vmul.f32 %v686_v45, %v1315_v53  ;;  %v726_v5 = vadd.f32 0.014752088, %v725_v27 }
 0x128   :  { %v838_v19 = vadd.f32 1.0, %v991_v31  ;;  %v577_v41 = vadd.f32 %v1060_v23, %v576_v46  ;;  %v585_v20 = vor.u32 1.1754944e-38, %v584_v14  ;;  %v615_v36 = vsub.f32 1.0, %v614_v58 }
 0x129   :  { %vm618_vm4 = vweird.f32 %v612_v4  ;;  %vm619_vm5 = vweird.f32 %v1062_v6  ;;  %v688_v2 = vadd.f32 0.112945676, %v687_v63  ;;  %v727_v8 = vmul.f32 %v726_v5, %v1401_v21 }
 0x12a   :  { %v854_v52 = vmul.f32 %v838_v19, %v1571_v56  ;;  %v581_v24 = vsel %vm580_vm3, %v1060_v23, %v577_v41  ;;  %v616_v29 = vmul.f32 %v1062_v6, %v615_v36  ;;  %vm1828_vm6 = vcmp.eq.f32.partialorder %v622_v47, 8.507059e+37  ;;  %vm1832_vm7 = vmor %vm618_vm4, %vm619_vm5  ;;  %v1987_v36 = vld [vmem:[#allocation3_spill] sm:$0xff] }
 0x12b   :  { %v1064_v62 = vpop.eup %1063  ;;  %v586_v16 = vsel %vm1816_vm2, %v585_v20, %v581_v24  ;;  %v625_v25 = vor.u32 1.1754944e-38, %v624_v55  ;;  %vm658_vm8 = vweird.f32 %v1808_v57  ;;  %v689_v0 = vmul.f32 %v688_v2, %v1315_v53 }
 0x12c   :  { %922 = vmatmul.f32.gmra.mxu2 %v854_v52  ;;  %v587_v33 = vmul.f32 %v586_v16, %v562_v10  ;;  %v654_v56 = vmul.f32 %v1064_v62, %v1808_v57  ;;  %v617_v17 = vadd.f32 %v1062_v6, %v616_v29  ;;  %v662_v60 = vand.u32 2147483647, %v1808_v57 }
 0x12d   :  { %v664_v18 = vand.u32 2147483648, %v1808_v57  ;;  %v728_v51 = vadd.f32 0.112945676, %v727_v8  ;;  %vm659_vm9 = vweird.f32 %v1064_v62  ;;  %v690_v13 = vadd.f32 0.4994258, %v689_v0  ;;  %v1986_v57 = vld [vmem:[#allocation2_spill] sm:$0xff] }
 0x12e   :  { %v992_v49 = vclamps-f32 %v587_v33, 1.0  ;;  %v655_v9 = vsub.f32 1.0, %v654_v56  ;;  %v717_v4 = vadd.f32 0.05243302, %v1484_v3  ;;  %v167_v12 = vmul.f32 0.5, %v1563_v43  ;;  %vm660_vm10 = vmor %vm658_vm8, %vm659_vm9 }
 0x12f   :  { %v621_v28 = vsel %vm1832_vm7, %v1062_v6, %v617_v17  ;;  %v729_v22 = vmul.f32 %v728_v51, %v1401_v21  ;;  %v691_v23 = vmul.f32 %v690_v13, %v1315_v53  ;;  %v642_v11 = vmul.f32 %v1983_v42, %v1265_v1 }
 0x130   :  { %v839_v7 = vadd.f32 1.0, %v992_v49  ;;  %v626_v50 = vsel %vm1828_vm6, %v625_v25, %v621_v28  ;;  %v656_v38 = vmul.f32 %v1064_v62, %v655_v9  ;;  %v665_v3 = vor.u32 1.1754944e-38, %v664_v18  ;;  %v1990_v25 = vld [vmem:[#allocation5_spill] sm:$0xff]  ;;  %v1991_v18 = vld [vmem:[#allocation7_spill] sm:$0xff] }
 0x131   :  { %v627_v37 = vmul.f32 %v626_v50, %v1984_v32  ;;  %v730_v43 = vadd.f32 0.4994258, %v729_v22  ;;  %vm663_vm11 = vcmp.eq.f32.partialorder %v662_v60, 8.507059e+37  ;;  %v692_v44 = vadd.f32 1.0, %v691_v23  ;;  %v1036_v23 = vld [vmem:[%s1942_s4] ss:$0 sm:$0xff] }
 0x132   :  { %v855_v54 = vmul.f32 %v839_v7, %v167_v12  ;;  %v657_v30 = vadd.f32 %v1064_v62, %v656_v38  ;;  %v718_v10 = vmul.f32 %v717_v4, %v1401_v21  ;;  %v679_v35 = vadd.f32 0.18741608, %v1985_v61  ;;  %v1992_v12 = vld [vmem:[#allocation4_spill] sm:$0xff] }
 0x133   :  { %v993_v48 = vclamps-f32 %v627_v37, 1.0  ;;  %v731_v39 = vmul.f32 %v730_v43, %v1401_v21  ;;  %1065 = vrcp.f32 %v692_v44  ;;  %v168_v14 = vmul.f32 0.5, %v1986_v57 }
 0x134   :  { %925 = vmatmul.f32.gmra.mxu2 %v855_v54  ;;  %v661_v1 = vsel %vm660_vm10, %v1064_v62, %v657_v30  ;;  %v719_v46 = vadd.f32 0.18741608, %v718_v10  ;;  %v680_v45 = vmul.f32 %v679_v35, %v1315_v53  ;;  %v704_v19 = vand.u32 2147483648, %v692_v44 }
 0x135   :  { %v666_v34 = vsel %vm663_vm11, %v665_v3, %v661_v1  ;;  %v732_v59 = vadd.f32 1.0, %v731_v39  ;;  %v840_v6 = vadd.f32 1.0, %v993_v48  ;;  %vm698_vm12 = vweird.f32 %v692_v44  ;;  %v1993_v3 = vld [vmem:[#allocation6_spill] sm:$0xff] }
 0x136   :  { %v667_v31 = vmul.f32 %v666_v34, %v642_v11  ;;  %v720_v47 = vmul.f32 %v719_v46, %v1401_v21  ;;  %v681_v41 = vadd.f32 1.1283791, %v680_v45  ;;  %v702_v20 = vand.u32 2147483647, %v692_v44 }
 0x137   :  { %1067 = vrcp.f32 %v732_v59  ;;  %v856_v40 = vmul.f32 %v840_v6, %v168_v14  ;;  %v169_v52 = vmul.f32 0.5, %v1987_v36  ;;  %v705_v62 = vor.u32 1.1754944e-38, %v704_v19 }
 0x138   :  { %v994_v58 = vclamps-f32 %v667_v31, 1.0  ;;  %v721_v8 = vadd.f32 1.1283791, %v720_v47  ;;  %v744_v16 = vand.u32 2147483648, %v732_v59  ;;  %vm738_vm15 = vweird.f32 %v732_v59 }
 0x139   :  { %v1066_v27 = vpop.eup %1065  ;;  %v742_v15 = vand.u32 2147483647, %v732_v59  ;;  %v682_v33 = vmul.f32 %v681_v41, %v1990_v25  ;;  %vm703_vm2 = vcmp.eq.f32.partialorder %v702_v20, 8.507059e+37  ;;  %v170_v28 = vmul.f32 0.5, %v1992_v12 }
 0x13a   :  { %v694_v55 = vmul.f32 %v1066_v27, %v692_v44  ;;  %vm699_vm13 = vweird.f32 %v1066_v27  ;;  %v841_v24 = vadd.f32 1.0, %v994_v58  ;;  %v745_v60 = vor.u32 1.1754944e-38, %v744_v16 }
 0x13b   :  { %vm1861_vm14 = vmor %vm698_vm12, %vm699_vm13  ;;  %v722_v51 = vmul.f32 %v721_v8, %v1991_v18  ;;  %vm743_vm4 = vcmp.eq.f32.partialorder %v742_v15, 8.507059e+37  ;;  %v171_v43 = vmul.f32 0.5, %v1993_v3 }
 0x13c   :  { %928 = vmatmul.f32.gmra.mxu2 %v856_v40  ;;  %v695_v5 = vsub.f32 1.0, %v694_v55  ;;  %v857_v56 = vmul.f32 %v841_v24, %v169_v52 }
 0x13d   :  { %v1068_v63 = vpop.eup %1067 }
 0x13e   :  { %v734_v2 = vmul.f32 %v1068_v63, %v732_v59  ;;  %v696_v53 = vmul.f32 %v1066_v27, %v695_v5  ;;  %vm739_vm1 = vweird.f32 %v1068_v63 }
 0x13f   :  { %vm740_vm3 = vmor %vm738_vm15, %vm739_vm1 }
 0x140   :  { %v735_v21 = vsub.f32 1.0, %v734_v2  ;;  %v697_v26 = vadd.f32 %v1066_v27, %v696_v53 }
 0x142   :  { %v736_v0 = vmul.f32 %v1068_v63, %v735_v21  ;;  %v701_v17 = vsel %vm1861_vm14, %v1066_v27, %v697_v26 }
 0x143   :  { %v706_v49 = vsel %vm703_vm2, %v705_v62, %v701_v17 }
 0x144   :  { %931 = vmatmul.f32.gmra.mxu2 %v857_v56  ;;  %v737_v9 = vadd.f32 %v1068_v63, %v736_v0  ;;  %v707_v13 = vmul.f32 %v706_v49, %v682_v33 }
 0x146   :  { %v741_v4 = vsel %vm740_vm3, %v1068_v63, %v737_v9  ;;  %v995_v22 = vclamps-f32 %v707_v13, 1.0 }
 0x147   :  { %v746_v7 = vsel %vm743_vm4, %v745_v60, %v741_v4 }
 0x148   :  { %v747_v50 = vmul.f32 %v746_v7, %v722_v51  ;;  %v842_v38 = vadd.f32 1.0, %v995_v22 }
 0x14a   :  { %v858_v42 = vmul.f32 %v842_v38, %v170_v28  ;;  %v996_v11 = vclamps-f32 %v747_v50, 1.0 }
 0x14b   :  { %v899_v32 = vpop.f32.mrf.mxu1 }
 0x14c   :  { %934 = vmatmul.f32.gmra.mxu2 %v858_v42  ;;  %v900_v37 = vadd.f32 %v1036_v23, %v899_v32  ;;  %v843_v54 = vadd.f32 1.0, %v996_v11 }
 0x14e   :  { %947 = vst.msk [vmem:[%s1943_s5] sm:$0xff] %vm44_vm0, %v900_v37  ;;  %v859_v30 = vmul.f32 %v843_v54, %v171_v43 }
 0x154   :  { %937 = vmatmul.f32.gmra.mxu2 %v859_v30 }
 0x16c   :  { %v902_v44 = vpop.f32.mrf.mxu1 }
 0x16d   :  { %v903_v10 = vadd.f32 %v1036_v23, %v902_v44 }
 0x16f   :  { %948 = vst.msk [vmem:[%s1943_s5 + $0x8] sm:$0xff] %vm44_vm0, %v903_v10 }
 0x176   :  { %v905_v48 = vpop.f32.mrf.mxu1 }
 0x177   :  { %v906_v39 = vadd.f32 %v1036_v23, %v905_v48 }
 0x179   :  { %949 = vst.msk [vmem:[%s1943_s5 + $0x10] sm:$0xff] %vm44_vm0, %v906_v39 }
 0x180   :  { %v908_v61 = vpop.f32.mrf.mxu1 }
 0x181   :  { %v909_v35 = vadd.f32 %v1036_v23, %v908_v61 }
 0x182   :  { %v941_v1 = vpop.f32.mrf.mxu3 }
 0x183   :  { %950 = vst.msk [vmem:[%s1943_s5 + $0x18] sm:$0xff] %vm44_vm0, %v909_v35  ;;  %v942_v34 = vadd.f32 %v1036_v23, %v941_v1 }
 0x185   :  { %961 = vst.msk [vmem:[%s1943_s5 + $0x70] sm:$0xff] %vm44_vm0, %v942_v34 }
 0x188   :  { %v911_v59 = vpop.f32.mrf.mxu1 }
 0x189   :  { %v912_v57 = vadd.f32 %v1036_v23, %v911_v59 }
 0x18b   :  { %951 = vst.msk [vmem:[%s1943_s5 + $0x20] sm:$0xff] %vm44_vm0, %v912_v57 }
 0x190   :  { %v914_v14 = vpop.f32.mrf.mxu1 }
 0x191   :  { %v915_v6 = vadd.f32 %v1036_v23, %v914_v14 }
 0x193   :  { %952 = vst.msk [vmem:[%s1943_s5 + $0x28] sm:$0xff] %vm44_vm0, %v915_v6 }
 0x198   :  { %v917_v31 = vpop.f32.mrf.mxu1 }
 0x199   :  { %v918_v46 = vadd.f32 %v1036_v23, %v917_v31 }
 0x19b   :  { %953 = vst.msk [vmem:[%s1943_s5 + $0x30] sm:$0xff] %vm44_vm0, %v918_v46 }
 0x1a4   :  { %v920_v45 = vpop.f32.mrf.mxu2 }
 0x1a5   :  { %v921_v27 = vadd.f32 %v1036_v23, %v920_v45 }
 0x1a7   :  { %954 = vst.msk [vmem:[%s1943_s5 + $0x38] sm:$0xff] %vm44_vm0, %v921_v27 }
 0x1a9   :  { %v944_v40 = vpop.f32.mrf.mxu3 }
 0x1aa   :  { %v945_v58 = vadd.f32 %v1036_v23, %v944_v40 }
 0x1ac   :  { %962 = vst.msk [vmem:[%s1943_s5 + $0x78] sm:$0xff] %vm44_vm0, %v945_v58 }
 0x1af   :  { %v923_v47 = vpop.f32.mrf.mxu2 }
 0x1b0   :  { %v924_v55 = vadd.f32 %v1036_v23, %v923_v47 }
 0x1b2   :  { %955 = vst.msk [vmem:[%s1943_s5 + $0x40] sm:$0xff] %vm44_vm0, %v924_v55 }
 0x1b7   :  { %v926_v19 = vpop.f32.mrf.mxu2 }
 0x1b8   :  { %v927_v41 = vadd.f32 %v1036_v23, %v926_v19 }
 0x1ba   :  { %956 = vst.msk [vmem:[%s1943_s5 + $0x48] sm:$0xff] %vm44_vm0, %v927_v41 }
 0x1bf   :  { %v929_v63 = vpop.f32.mrf.mxu2 }
 0x1c0   :  { %v930_v5 = vadd.f32 %v1036_v23, %v929_v63 }
 0x1c2   :  { %957 = vst.msk [vmem:[%s1943_s5 + $0x50] sm:$0xff] %vm44_vm0, %v930_v5 }
 0x1c7   :  { %v932_v20 = vpop.f32.mrf.mxu2 }
 0x1c8   :  { %v933_v36 = vadd.f32 %v1036_v23, %v932_v20 }
 0x1ca   :  { %958 = vst.msk [vmem:[%s1943_s5 + $0x58] sm:$0xff] %vm44_vm0, %v933_v36 }
 0x1cf   :  { %v935_v52 = vpop.f32.mrf.mxu2 }
 0x1d0   :  { %v936_v24 = vadd.f32 %v1036_v23, %v935_v52 }
 0x1d2   :  { %959 = vst.msk [vmem:[%s1943_s5 + $0x60] sm:$0xff] %vm44_vm0, %v936_v24 }
 0x1d7   :  { %v938_v2 = vpop.f32.mrf.mxu2 }
 0x1d8   :  { %v939_v8 = vadd.f32 %v1036_v23, %v938_v2 }
 0x1da   :  { %960 = vst.msk [vmem:[%s1943_s5 + $0x68] sm:$0xff] %vm44_vm0, %v939_v8 }

</bundles_post_ra>
